<compile_context>
chip_gen: v7x
topology: tpu7x:2x2x1
jax: 0.10.0
libtpu: 0.0.40
codegen_flags: <defaults>
</compile_context>

<pallas_src>
from functools import partial

import jax
import jax.numpy as jnp
from jax.experimental import pallas as pl
from jax.experimental.pallas import tpu as pltpu


# --------------------------------------------------------------------------
# Kernels
# --------------------------------------------------------------------------
def _normalize_rows(x, epsilon):
    """Row-wise Ba layer norm core (two-pass, f32 math)."""
    xf = x.astype(jnp.float32)
    mean = jnp.mean(xf, axis=1, keepdims=True)
    center = xf - mean
    var = jnp.mean(center * center, axis=1, keepdims=True)
    std = jnp.sqrt(var)
    # Per-row reciprocal on the (TILE_N, 1) column -> EUP; broadcast mul -> VPU.
    inv = pl.reciprocal(std + epsilon, approx=False)
    return center * inv


def _ba_ln_affine_kernel(x_ref, alpha_ref, beta_ref, o_ref, *, epsilon):
    out = _normalize_rows(x_ref[...], epsilon)
    out = alpha_ref[...].astype(jnp.float32) * out + beta_ref[...].astype(jnp.float32)
    o_ref[...] = out.astype(o_ref.dtype)


def _ba_ln_plain_kernel(x_ref, o_ref, *, epsilon):
    o_ref[...] = _normalize_rows(x_ref[...], epsilon).astype(o_ref.dtype)


# --------------------------------------------------------------------------
# Wrapper
# --------------------------------------------------------------------------
_VMEM_LIMIT_BYTES = 32 * 1024 * 1024   # safe on v5e/v6e (128 MiB) and v7x (64 MiB)
_TILE_BUDGET_BYTES = 4 * 1024 * 1024   # per input tile; x4 (dbl-buffered in+out)
_MAX_TILE_ROWS = 1024


def _choose_tile_rows(n, d, dtype, max_tile_rows=None):
    dtype_bytes = jnp.dtype(dtype).itemsize
    # Sublane multiple: 8 rows per 32-bit vreg sublane group; packed dtypes
    # pack 2x / 4x rows per sublane.
    sublane = max(8, 32 // max(1, dtype_bytes))

    row_bytes = max(1, d * dtype_bytes)
    budget_rows = (_TILE_BUDGET_BYTES // row_bytes) // sublane * sublane
    tile_n = min(_MAX_TILE_ROWS, max(sublane, budget_rows))
    if max_tile_rows is not None:
        tile_n = min(tile_n, max(1, max_tile_rows))

    if tile_n >= n:
        # Single block covering the full batch dim (legal even if n % 8 != 0,
        # since the block dim equals the full array dim).
        return n
    # Multi-block: keep the tile sublane-aligned; ragged last block is fine
    # because rows are independent and OOB rows are dropped on store.
    return max(sublane, tile_n // sublane * sublane)


def ba_layer_norm(x, alpha=None, beta=None, *, epsilon=1e-5, learnable=True,
                  max_tile_rows=None):
    """Pallas implementation of BaLayerNorm.forward.

    x:     any shape (N, ...) whose trailing dims flatten to input_size
    alpha: (1, input_size)   (only used / required when learnable=True)
    beta:  (1, input_size)
    """
    orig_shape = x.shape
    n = orig_shape[0]
    x2d = x.reshape(n, -1)
    d = x2d.shape[1]

    tile_n = _choose_tile_rows(n, d, x2d.dtype, max_tile_rows)
    grid = (pl.cdiv(n, tile_n),)

    x_spec = pl.BlockSpec((tile_n, d), lambda i: (i, 0))
    out_spec = pl.BlockSpec((tile_n, d), lambda i: (i, 0))

    cparams = pltpu.CompilerParams(
        dimension_semantics=("parallel",),        # rows independent -> megacore
        vmem_limit_bytes=_VMEM_LIMIT_BYTES,
    )

    if learnable:
        assert alpha is not None and beta is not None
        assert alpha.shape == (1, d) and beta.shape == (1, d)
        out2d = pl.pallas_call(
            partial(_ba_ln_affine_kernel, epsilon=epsilon),
            out_shape=jax.ShapeDtypeStruct((n, d), x2d.dtype),
            grid=grid,
            in_specs=[
                x_spec,
                pl.BlockSpec((1, d), lambda i: (0, 0)),
                pl.BlockSpec((1, d), lambda i: (0, 0)),
            ],
            out_specs=out_spec,
            compiler_params=cparams,
        )(x2d, alpha, beta)
    else:
        # No alpha/beta DMA at all on the non-learnable path.
        out2d = pl.pallas_call(
            partial(_ba_ln_plain_kernel, epsilon=epsilon),
            out_shape=jax.ShapeDtypeStruct((n, d), x2d.dtype),
            grid=grid,
            in_specs=[x_spec],
            out_specs=out_spec,
            compiler_params=cparams,
        )(x2d)

    return out2d.reshape(orig_shape)


# --------------------------------------------------------------------------
# Pure-JAX reference (mirrors the PyTorch forward) for verification
# --------------------------------------------------------------------------
def _reference(x, alpha=None, beta=None, epsilon=1e-5, learnable=True):
    size = x.shape
    x2 = x.reshape(size[0], -1).astype(jnp.float32)
    mean = jnp.mean(x2, axis=1, keepdims=True)
    center = x2 - mean
    std = jnp.sqrt(jnp.mean(center * center, axis=1, keepdims=True))
    out = center / (std + epsilon)
    if learnable:
        out = alpha * out + beta
    return out.reshape(size)


if __name__ == "__main__":
    key = jax.random.PRNGKey(0)
    kx, ka, kb, kx2, kx3 = jax.random.split(key, 5)

    # --- Case 1: small 2-D input, learnable affine path ---------------------
    batch, hidden = 4, 32
    x = jax.random.normal(kx, (batch, hidden), dtype=jnp.float32)
    alpha = jax.random.normal(ka, (1, hidden), dtype=jnp.float32) * 0.1 + 1.0
    beta = jax.random.normal(kb, (1, hidden), dtype=jnp.float32) * 0.1

    out = ba_layer_norm(x, alpha, beta, epsilon=1e-5, learnable=True)
    out = jax.block_until_ready(out)
    ref = _reference(x, alpha, beta, epsilon=1e-5, learnable=True)
    assert out.shape == x.shape
    assert jnp.allclose(out, ref, atol=1e-5, rtol=1e-5), "case1 mismatch"

    # --- Case 2: ragged batch, forced small tile -> exercises grid/pipeline --
    n2, d2 = 20, 256
    x2 = jax.random.normal(kx2, (n2, d2), dtype=jnp.float32)
    out2 = ba_layer_norm(x2, epsilon=1e-5, learnable=False, max_tile_rows=8)
    out2 = jax.block_until_ready(out2)
    ref2 = _reference(x2, epsilon=1e-5, learnable=False)
    assert out2.shape == x2.shape
    assert jnp.allclose(out2, ref2, atol=1e-5, rtol=1e-5), "case2 mismatch"

    # --- Case 3: higher-rank input flattened to (N, -1), non-learnable -------
    x3 = jax.random.normal(kx3, (2, 4, 16), dtype=jnp.float32)  # input_size = 64
    out3 = ba_layer_norm(x3, epsilon=1e-5, learnable=False)
    out3 = jax.block_until_ready(out3)
    ref3 = _reference(x3, epsilon=1e-5, learnable=False)
    assert out3.shape == x3.shape
    assert jnp.allclose(out3, ref3, atol=1e-5, rtol=1e-5), "case3 mismatch"

    print("KERNEL_OK")
</pallas_src>

<mosaic_0001>
module attributes {stable_mosaic.version = 11 : i64} {
  func.func @_ba_ln_affine_kernel(%arg0: i32, %arg1: memref<4x32xf32, #tpu.memory_space<vmem>>, %arg2: memref<1x32xf32, #tpu.memory_space<vmem>>, %arg3: memref<1x32xf32, #tpu.memory_space<vmem>>, %arg4: memref<4x32xf32, #tpu.memory_space<vmem>>) attributes {dimension_semantics = [#tpu.dimension_semantics<parallel>], iteration_bounds = array<i64: 1>, scalar_prefetch = 0 : i64, scratch_operands = 0 : i64, tpu.core_type = #tpu.core_type<tc>, window_params = [{transform_indices = @transform_0, window_bounds = array<i64: 4, 32>}, {pipeline_mode = #tpu.pipeline_mode<synchronous>, transform_indices = @transform_1, window_bounds = array<i64: 1, 32>}, {pipeline_mode = #tpu.pipeline_mode<synchronous>, transform_indices = @transform_2, window_bounds = array<i64: 1, 32>}, {transform_indices = @transform_3, window_bounds = array<i64: 4, 32>}]} {
    %c0 = arith.constant 0 : index
    %c0_0 = arith.constant 0 : index
    %0 = vector.load %arg1[%c0, %c0_0] : memref<4x32xf32, #tpu.memory_space<vmem>>, vector<4x32xf32>
    %cst = arith.constant dense<0.000000e+00> : vector<4xf32>
    %1 = vector.multi_reduction <add>, %0, %cst [1] : vector<4x32xf32> to vector<4xf32>
    %2 = vector.shape_cast %1 : vector<4xf32> to vector<4x1xf32>
    %cst_1 = arith.constant 3.200000e+01 : f32
    %3 = vector.broadcast %cst_1 : f32 to vector<4x1xf32>
    %4 = arith.divf %2, %3 : vector<4x1xf32>
    %5 = vector.broadcast %4 : vector<4x1xf32> to vector<4x32xf32>
    %6 = arith.subf %0, %5 : vector<4x32xf32>
    %7 = arith.mulf %6, %6 : vector<4x32xf32>
    %cst_2 = arith.constant dense<0.000000e+00> : vector<4xf32>
    %8 = vector.multi_reduction <add>, %7, %cst_2 [1] : vector<4x32xf32> to vector<4xf32>
    %9 = vector.shape_cast %8 : vector<4xf32> to vector<4x1xf32>
    %cst_3 = arith.constant 3.200000e+01 : f32
    %10 = vector.broadcast %cst_3 : f32 to vector<4x1xf32>
    %11 = arith.divf %9, %10 : vector<4x1xf32>
    %12 = math.sqrt %11 : vector<4x1xf32>
    %cst_4 = arith.constant 9.99999974E-6 : f32
    %13 = vector.broadcast %cst_4 : f32 to vector<4x1xf32>
    %14 = arith.addf %12, %13 : vector<4x1xf32>
    %15 = tpu.reciprocal %14 : vector<4x1xf32> -> vector<4x1xf32>
    %16 = vector.broadcast %15 : vector<4x1xf32> to vector<4x32xf32>
    %17 = arith.mulf %6, %16 : vector<4x32xf32>
    %c0_5 = arith.constant 0 : index
    %c0_6 = arith.constant 0 : index
    %18 = vector.load %arg2[%c0_5, %c0_6] : memref<1x32xf32, #tpu.memory_space<vmem>>, vector<1x32xf32>
    %19 = vector.broadcast %18 : vector<1x32xf32> to vector<4x32xf32>
    %20 = arith.mulf %19, %17 : vector<4x32xf32>
    %c0_7 = arith.constant 0 : index
    %c0_8 = arith.constant 0 : index
    %21 = vector.load %arg3[%c0_7, %c0_8] : memref<1x32xf32, #tpu.memory_space<vmem>>, vector<1x32xf32>
    %22 = vector.broadcast %21 : vector<1x32xf32> to vector<4x32xf32>
    %23 = arith.addf %20, %22 : vector<4x32xf32>
    %c0_9 = arith.constant 0 : index
    %c0_10 = arith.constant 0 : index
    %24 = vector.load %arg4[%c0_9, %c0_10] : memref<4x32xf32, #tpu.memory_space<vmem>>, vector<4x32xf32>
    tpu.vector_store %arg4[%c0_9, %c0_10], %23 {strides = array<i32>} : memref<4x32xf32, #tpu.memory_space<vmem>>, vector<4x32xf32>,
    return
  }
  func.func @transform_0(%arg0: i32) -> (i32, i32) {
    %c0_i32 = arith.constant 0 : i32
    %c0_i32_0 = arith.constant 0 : i32
    return %arg0, %c0_i32 : i32, i32
  }
  func.func @transform_1(%arg0: i32) -> (i32, i32) {
    %c0_i32 = arith.constant 0 : i32
    %c0_i32_0 = arith.constant 0 : i32
    %c0_i32_1 = arith.constant 0 : i32
    return %c0_i32, %c0_i32_0 : i32, i32
  }
  func.func @transform_2(%arg0: i32) -> (i32, i32) {
    %c0_i32 = arith.constant 0 : i32
    %c0_i32_0 = arith.constant 0 : i32
    %c0_i32_1 = arith.constant 0 : i32
    return %c0_i32, %c0_i32_0 : i32, i32
  }
  func.func @transform_3(%arg0: i32) -> (i32, i32) {
    %c0_i32 = arith.constant 0 : i32
    %c0_i32_0 = arith.constant 0 : i32
    return %arg0, %c0_i32 : i32, i32
  }
}

</mosaic_0001>

<bundles_post_ra>
// kernel: tpu_custom_call.1
= control target key start
LH: loop header
LB: loop body
LE: loop exit
PB: predicated region body
PF: predicated region fallthrough
CT: control target
= control target key end

     0   :  { %8 = vsyncpa [#allocation3], 0  ;;  %s193_s0 = inlined_call_operand.hbm [shape: f32[4,32], index: 0, kind: input, shape index: {}]   ;;  %s194_s1 = inlined_call_operand.vmem [shape: f32[1,32], index: 1, kind: input, shape index: {}]   ;;  %s195_s2 = inlined_call_operand.vmem [shape: f32[1,32], index: 2, kind: input, shape index: {}]   ;;  %s196_s3 = inlined_call_operand.hbm [shape: f32[4,32], index: 3, kind: output, shape index: {}]  }
   0x1   :  { %9 = vsyncpa [#allocation4], 0  ;;  %s138_s12 = smov [#allocation2]   ;;  %s90_s16 = scalar_lea.hbm %s193_s0, 64 }
   0x2   :  { %s16_s13 = sshll.u32 %s138_s12, 4  ;;  %p91_p0 = scmp.ne.s32.totalorder %s193_s0, %s90_s16  ;;  %s17_s13 = int_to_ptr.vmem [resolvable:$true] %s16_s13 }
   0x3   :  { %p94_p1 = scmp.lt.u32.totalorder %s90_s16, %s193_s0 }
   0x5   :  { %p96_p2 = pnand %p94_p1, %p91_p0 }
   0x7   :  { %99 = shalt.err (!%p96_p2)
}
   0x8   :  { %s100_s21 = scalar_lea.vmem %s17_s13, 64  ;;  %p105_p4 = scmp.lt.s32.totalorder %s17_s13, %s17_s13 }
   0x9   :  { %p101_p3 = scmp.ne.s32.totalorder %s17_s13, %s100_s21  ;;  %p106_p5 = scmp.lt.s32.totalorder %s100_s21, %s100_s21 }
   0xb   :  { %p107_p6 = por %p106_p5, %p105_p4 }
   0xd   :  { %p108_p7 = pnand %p107_p6, %p101_p3 }
   0xf   :  { %111 = shalt.err (!%p108_p7)
}
  0x10   :  { %19 = dma.hbm_to_vmem [thread:$0]  %s193_s0, 64, %s17_s13, [#allocation3]  }
  0x11   :  { %134 = dma.done.wait [#allocation3], 64  }
  0x12   :  { %135 = vsyncadd [#allocation3], 4294967232  ;;  %vm28_vm0 = vcmask 257024   ;;  %v27_v0 = vld [vmem:[#allocation2] sm:$0xf]  ;;  %s139_s27 = smov [#allocation5]  }
  0x13   :  { %v29_v1 = vsel %vm28_vm0, %v27_v0, 0.0  ;;  %v82_v16 = vld [vmem:[%s194_s1] ss:$0 sm:$0xff]  ;;  %s73_s28 = sshll.u32 %s139_s27, 4  ;;  %s74_s28 = int_to_ptr.vmem [resolvable:$true] %s73_s28 }
  0x14   :  { %30 = vadd.xlane.f32.xlu0 %v29_v1  ;;  %v83_v18 = vld [vmem:[%s195_s2] ss:$0 sm:$0xff]  ;;  %s112_s29 = scalar_lea.vmem %s74_s28, 64  ;;  %p117_p9 = scmp.lt.s32.totalorder %s74_s28, %s74_s28 }
  0x15   :  { %p113_p8 = scmp.ne.s32.totalorder %s74_s28, %s112_s29  ;;  %p118_p10 = scmp.lt.s32.totalorder %s112_s29, %s112_s29 }
  0x17   :  { %p119_p11 = por %p118_p10, %p117_p9 }
  0x19   :  { %p120_p12 = pnand %p119_p11, %p113_p8 }
  0xa1   :  { %v31_v2 = vpop.xlane.xlu0 %30 }
  0xa2   :  { %v33_v3 = vmul.f32 0.03125, %v31_v2 }
  0xa4   :  { %v34_v4 = vsub.f32 %v27_v0, %v33_v3 }
  0xa6   :  { %v35_v5 = vmul.f32 %v34_v4, %v34_v4 }
  0xa8   :  { %v36_v6 = vsel %vm28_vm0, %v35_v5, 0.0 }
  0xa9   :  { %37 = vadd.xlane.f32.xlu0 %v36_v6 }
 0x136   :  { %v38_v7 = vpop.xlane.xlu0 %37 }
 0x137   :  { %v39_v8 = vmul.f32 0.03125, %v38_v7 }
 0x139   :  { %86 = vrsqrt.f32 %v39_v8  ;;  %vm42_vm1 = vcmp.eq.f32.partialorder %v39_v8, inf  ;;  %v45_v11 = vand.u32 2147483648, %v39_v8  ;;  %vm44_vm2 = vcmp.eq.f32.partialorder %v39_v8, 0.0 }
 0x143   :  { %v87_v9 = vpop.eup %86 }
 0x144   :  { %v41_v10 = vmul.f32 %v87_v9, %v39_v8 }
 0x146   :  { %v43_v12 = vsel %vm42_vm1, %v39_v8, %v41_v10 }
 0x147   :  { %v46_v13 = vsel %vm44_vm2, %v45_v11, %v43_v12 }
 0x148   :  { %v47_v14 = vadd.f32 1e-05, %v46_v13 }
 0x14a   :  { %88 = vrcp.f32 %v47_v14 }
 0x154   :  { %v89_v15 = vpop.eup %88 }
 0x155   :  { %v49_v17 = vmul.f32 %v89_v15, %v34_v4 }
 0x157   :  { %v57_v19 = vmul.f32 %v82_v16, %v49_v17 }
 0x159   :  { %v65_v20 = vadd.f32 %v83_v18, %v57_v19 }
 0x15b   :  { %66 = vst.msk [vmem:[#allocation5] sm:$0xf] %vm28_vm0, %v65_v20 }
 0x15c   :  { %123 = shalt.err (!%p120_p12)
}
 0x15d   :  { %s124_s4 = scalar_lea.hbm %s196_s3, 64 }
 0x15e   :  { %p125_p13 = scmp.ne.s32.totalorder %s196_s3, %s124_s4  ;;  %p128_p0 = scmp.lt.u32.totalorder %s124_s4, %s196_s3 }
 0x160   :  { %p130_p1 = pnand %p128_p0, %p125_p13 }
 0x162   :  { %133 = shalt.err (!%p130_p1)
}
 0x163   :  { %76 = dma.vmem_to_hbm [thread:$0]  %s74_s28, 64, %s196_s3, [#allocation4]  }
 0x164   :  { %136 = dma.done.wait [#allocation4], 64  }
 0x165   :  { %137 = vsyncadd [#allocation4], 4294967232 }
 0x166   :  { %80 = vsyncpa [#allocation3], 1 }
 0x167   :  { %81 = vsyncpa [#allocation4], 1 }

</bundles_post_ra>
